<compile_context>
chip_gen: v7x
topology: tpu7x:2x2x1
jax: 0.10.0
libtpu: 0.0.40
codegen_flags: <defaults>
</compile_context>

<pallas_src>
import functools

import numpy as np
import jax
import jax.numpy as jnp
from jax.experimental import pallas as pl
from jax.experimental.pallas import tpu as pltpu

C_MAX = 12    # max corners per room (PyTorch normals buffer is 13 = 12 walls + 1)
R16 = 16      # sublane-aligned corner-row count used inside the kernel
R_OUT = 13    # output rows per batch element (module layout)
LANE = 128    # TPU lane width
TB_CAP = 8192 # max lanes per grid step (working set stays in KBs .. low MBs)


def _round_up(x, m):
    return ((x + m - 1) // m) * m


def _pick_tb(bp):
    """Largest 128-multiple divisor of bp, <= TB_CAP; when bp >= 256 also <= bp//2
    so the grid has >= 2 iterations (keeps the 2nd v7x TensorCore busy)."""
    limit = min(TB_CAP, bp // 2) if bp >= 2 * LANE else bp
    limit = max(limit, LANE)
    best = LANE
    tb = LANE
    while tb <= limit:
        if bp % tb == 0:
            best = tb
        tb += LANE
    return best


def _render_kernel(gt_ref, nums_ref, ratio_ref, out_ref, *, cam_h):
    # All tiles carry batch on the lane (last) axis.
    lon = gt_ref[:R16, :]                    # (16, TB) f32; rows >= 12 are pad
    lat = gt_ref[R16:, :]                    # (16, TB) f32; 8-sublane aligned view
    num = nums_ref[...]                      # (1, TB) i32
    ratio = ratio_ref[...]                   # (1, TB) f32
    tb = lon.shape[1]

    # lonlat2xyz_up with the scale folded into cos(lat):
    #   s  = -(cH * ratio) / sin(lat)
    #   xc = cos(lat) * s * sin(lon), zc = cos(lat) * s * cos(lon)
    t = jnp.cos(lat) * ((-cam_h) * ratio) / jnp.sin(lat)
    xc = t * jnp.sin(lon)
    zc = t * jnp.cos(lon)

    # Mask padded corner rows and padded batch lanes (num == 0) so inf/NaN from
    # junk lat / ratio padding can never be selected downstream.
    row = jax.lax.broadcasted_iota(jnp.int32, (R16, tb), 0)
    valid = row < num                        # (16, TB) bool
    xc = jnp.where(valid, xc, 0.0)
    zc = jnp.where(valid, zc, 0.0)

    # "Next" corner = rotate by one along the corner (sublane) axis (XLU vrot).
    # Row num-1 is fixed up to wrap to corner 0; rows >= num are masked anyway.
    xn = pltpu.roll(xc, R16 - 1, axis=0)     # xn[r] = xc[(r+1) mod 16]
    zn = pltpu.roll(zc, R16 - 1, axis=0)
    wrap = row == (num - 1)
    xn = jnp.where(wrap, xc[0:1, :], xn)
    zn = jnp.where(wrap, zc[0:1, :], zn)

    # Wall edge v = next - cur; normal = normalize(cross(v, y_axis)) = (-vz, 0, vx)/|.|
    vx = xn - xc
    vz = zn - zc
    inv = jax.lax.rsqrt(vx * vx + vz * vz)   # EUP rsqrt
    nx = jnp.where(valid, -vz * inv, 0.0)
    nz = jnp.where(valid, vx * inv, 0.0)

    # Rows < num -> normal[r]; row num -> normal[0]; rows > num -> 0.  The y-plane
    # is exactly zero and is added wrapper-side (no constant-zero writeback here).
    dup = row == num
    out_ref[0] = jnp.where(dup, nx[0:1, :], nx)
    out_ref[1] = jnp.where(dup, nz[0:1, :], nz)


def render_loss_forward(gt_up, corner_nums, up_down_ratio, camera_height=1.6):
    """JAX/Pallas equivalent of RenderLoss.forward (mode='origin').

    gt_up:         (B, 12, 2) float — (lon, lat) ceiling corners.
    corner_nums:   (B,) int    — valid corners per room.
    up_down_ratio: (B,) float.
    Returns:       (B, 13, 3) float32 normals, matching the PyTorch layout.
    """
    B, C, two = gt_up.shape
    assert two == 2 and C == C_MAX and camera_height > 0

    BP = _round_up(B, LANE)                  # batch lives on the lane axis
    TB = _pick_tb(BP)
    pad = BP - B

    # Single wrapper transpose; lon rows 0..15, lat rows 16..31 (both 8-aligned).
    gt = jnp.transpose(gt_up.astype(jnp.float32), (2, 1, 0))      # (2, 12, B)
    gt = jnp.pad(gt, ((0, 0), (0, R16 - C_MAX), (0, pad)))        # (2, 16, BP)
    merged = gt.reshape(2 * R16, BP)                              # (32, BP)

    nums = corner_nums.astype(jnp.int32)
    ratio = up_down_ratio.astype(jnp.float32)
    if pad:
        nums = jnp.pad(nums, (0, pad))       # num = 0 -> padded lanes fully masked
        ratio = jnp.pad(ratio, (0, pad))
    nums = nums.reshape(1, BP)
    ratio = ratio.reshape(1, BP)

    kern = functools.partial(_render_kernel, cam_h=float(camera_height))
    out = pl.pallas_call(
        kern,
        out_shape=jax.ShapeDtypeStruct((2, R16, BP), jnp.float32),
        grid=(BP // TB,),
        in_specs=[
            pl.BlockSpec((2 * R16, TB), lambda i: (0, i)),        # merged lon/lat
            pl.BlockSpec((1, TB), lambda i: (0, i)),              # corner_nums
            pl.BlockSpec((1, TB), lambda i: (0, i)),              # up_down_ratio
        ],
        out_specs=pl.BlockSpec((2, R16, TB), lambda i: (0, 0, i)),
        compiler_params=pltpu.CompilerParams(
            dimension_semantics=("parallel",)),                   # shards across TCs
    )(merged, nums, ratio)

    # Lane-dense (2, 16, BP) -> module layout (B, 13, 3); the constant y=0 column
    # is inserted here instead of being written by the kernel.
    xz = jnp.transpose(out[:, :R_OUT, :B], (2, 1, 0))             # (B, 13, 2)
    zero = jnp.zeros((B, R_OUT, 1), jnp.float32)
    return jnp.concatenate([xz[..., 0:1], zero, xz[..., 1:2]], axis=-1)


def _reference(gt_up, nums, ratio, cam_h):
    """NumPy mirror of the PyTorch RenderLoss.forward (origin path)."""
    gt_up = np.asarray(gt_up, np.float64)
    ratio = np.asarray(ratio, np.float64)
    B = gt_up.shape[0]
    lon = gt_up[..., 0]
    lat = gt_up[..., 1]
    x = np.cos(lat) * np.sin(lon)
    y = np.sin(lat)
    z = np.cos(lat) * np.cos(lon)
    xyz = np.stack([x, y, z], axis=-1)
    s = -(cam_h * ratio[:, None, None]) / xyz[..., 1:2]
    xyz = xyz * s
    out = np.zeros((B, R_OUT, 3), np.float32)
    for i, n in enumerate(np.asarray(nums)):
        n = int(n)
        c = xyz[i, :n]
        c = np.concatenate([c, c[0:1]], axis=0)
        normals = []
        for j in range(1, n + 1):
            v = c[j] - c[j - 1]
            cr = np.array([-v[2], 0.0, v[0]])
            cr = cr / np.linalg.norm(cr)
            normals.append(cr)
        normals.append(normals[0])
        out[i, : n + 1] = np.stack(normals, axis=0).astype(np.float32)
    return out


if __name__ == "__main__":
    B = 2
    key = jax.random.PRNGKey(0)
    k1, k2, k3 = jax.random.split(key, 3)
    # Ceiling corners: lon in (-pi, pi), lat bounded away from 0 (above horizon).
    lon = jax.random.uniform(k1, (B, C_MAX, 1), minval=-np.pi, maxval=np.pi)
    lat = jax.random.uniform(k2, (B, C_MAX, 1), minval=-1.2, maxval=-0.3)
    gt_up = jnp.concatenate([lon, lat], axis=-1).astype(jnp.float32)
    corner_nums = jnp.array([5, 8], dtype=jnp.int32)      # valid corners per room
    up_down_ratio = jax.random.uniform(k3, (B,), minval=0.3, maxval=0.8).astype(jnp.float32)

    out = render_loss_forward(gt_up, corner_nums, up_down_ratio, camera_height=1.6)
    out = jax.block_until_ready(out)

    ref = _reference(np.asarray(gt_up), np.asarray(corner_nums),
                     np.asarray(up_down_ratio), 1.6)
    np.testing.assert_allclose(np.asarray(out), ref, atol=1e-5, rtol=1e-4)
    print("KERNEL_OK")
</pallas_src>

<mosaic_0001>
module attributes {stable_mosaic.version = 11 : i64} {
  func.func @_render_kernel(%arg0: i32, %arg1: memref<32x128xf32, #tpu.memory_space<vmem>>, %arg2: memref<1x128xi32, #tpu.memory_space<vmem>>, %arg3: memref<1x128xf32, #tpu.memory_space<vmem>>, %arg4: memref<2x16x128xf32, #tpu.memory_space<vmem>>) attributes {dimension_semantics = [#tpu.dimension_semantics<parallel>], iteration_bounds = array<i64: 1>, scalar_prefetch = 0 : i64, scratch_operands = 0 : i64, tpu.core_type = #tpu.core_type<tc>, window_params = [{transform_indices = @transform_0, window_bounds = array<i64: 32, 128>}, {transform_indices = @transform_1, window_bounds = array<i64: 1, 128>}, {transform_indices = @transform_2, window_bounds = array<i64: 1, 128>}, {transform_indices = @transform_3, window_bounds = array<i64: 2, 16, 128>}]} {
    %c0 = arith.constant 0 : index
    %c0_0 = arith.constant 0 : index
    %0 = vector.load %arg1[%c0, %c0_0] : memref<32x128xf32, #tpu.memory_space<vmem>>, vector<16x128xf32>
    %c16 = arith.constant 16 : index
    %c0_1 = arith.constant 0 : index
    %1 = vector.load %arg1[%c16, %c0_1] : memref<32x128xf32, #tpu.memory_space<vmem>>, vector<16x128xf32>
    %c0_2 = arith.constant 0 : index
    %c0_3 = arith.constant 0 : index
    %2 = vector.load %arg2[%c0_2, %c0_3] : memref<1x128xi32, #tpu.memory_space<vmem>>, vector<1x128xi32>
    %c0_4 = arith.constant 0 : index
    %c0_5 = arith.constant 0 : index
    %3 = vector.load %arg3[%c0_4, %c0_5] : memref<1x128xf32, #tpu.memory_space<vmem>>, vector<1x128xf32>
    %4 = math.cos %1 : vector<16x128xf32>
    %cst = arith.constant -1.600000e+00 : f32
    %5 = vector.broadcast %cst : f32 to vector<1x128xf32>
    %6 = arith.mulf %5, %3 : vector<1x128xf32>
    %7 = vector.broadcast %6 : vector<1x128xf32> to vector<16x128xf32>
    %8 = arith.mulf %4, %7 : vector<16x128xf32>
    %9 = math.sin %1 : vector<16x128xf32>
    %10 = arith.divf %8, %9 : vector<16x128xf32>
    %11 = math.sin %0 : vector<16x128xf32>
    %12 = arith.mulf %10, %11 : vector<16x128xf32>
    %13 = math.cos %0 : vector<16x128xf32>
    %14 = arith.mulf %10, %13 : vector<16x128xf32>
    %15 = tpu.iota {dimensions = array<i32: 0>} : vector<16x128xi32>
    %16 = vector.broadcast %2 : vector<1x128xi32> to vector<16x128xi32>
    %17 = arith.cmpi slt, %15, %16 : vector<16x128xi32>
    %cst_6 = arith.constant 0.000000e+00 : f32
    %18 = vector.broadcast %cst_6 : f32 to vector<16x128xf32>
    %19 = arith.select %17, %12, %18 : vector<16x128xi1>, vector<16x128xf32>
    %cst_7 = arith.constant 0.000000e+00 : f32
    %20 = vector.broadcast %cst_7 : f32 to vector<16x128xf32>
    %21 = arith.select %17, %14, %20 : vector<16x128xi1>, vector<16x128xf32>
    %c15_i32 = arith.constant 15 : i32
    %22 = tpu.dynamic_rotate %19 by %c15_i32 dim 0 : vector<16x128xf32>, i32 -> vector<16x128xf32>
    %c15_i32_8 = arith.constant 15 : i32
    %23 = tpu.dynamic_rotate %21 by %c15_i32_8 dim 0 : vector<16x128xf32>, i32 -> vector<16x128xf32>
    %c1_i32 = arith.constant 1 : i32
    %24 = vector.broadcast %c1_i32 : i32 to vector<1x128xi32>
    %25 = arith.subi %2, %24 : vector<1x128xi32>
    %26 = vector.broadcast %25 : vector<1x128xi32> to vector<16x128xi32>
    %27 = arith.cmpi eq, %15, %26 : vector<16x128xi32>
    %28 = vector.extract_strided_slice %19 {offsets = [0, 0], sizes = [1, 128], strides = [1, 1]} : vector<16x128xf32> to vector<1x128xf32>
    %29 = vector.shape_cast %28 : vector<1x128xf32> to vector<1x128xf32>
    %30 = vector.broadcast %29 : vector<1x128xf32> to vector<16x128xf32>
    %31 = arith.select %27, %30, %22 : vector<16x128xi1>, vector<16x128xf32>
    %32 = vector.extract_strided_slice %21 {offsets = [0, 0], sizes = [1, 128], strides = [1, 1]} : vector<16x128xf32> to vector<1x128xf32>
    %33 = vector.shape_cast %32 : vector<1x128xf32> to vector<1x128xf32>
    %34 = vector.broadcast %33 : vector<1x128xf32> to vector<16x128xf32>
    %35 = arith.select %27, %34, %23 : vector<16x128xi1>, vector<16x128xf32>
    %36 = arith.subf %31, %19 : vector<16x128xf32>
    %37 = arith.subf %35, %21 : vector<16x128xf32>
    %38 = arith.mulf %36, %36 : vector<16x128xf32>
    %39 = arith.mulf %37, %37 : vector<16x128xf32>
    %40 = arith.addf %38, %39 : vector<16x128xf32>
    %41 = math.rsqrt %40 : vector<16x128xf32>
    %cst_9 = arith.constant 0.000000e+00 : f32
    %42 = vector.broadcast %cst_9 : f32 to vector<16x128xf32>
    %43 = arith.subf %42, %37 : vector<16x128xf32>
    %44 = arith.mulf %43, %41 : vector<16x128xf32>
    %cst_10 = arith.constant 0.000000e+00 : f32
    %45 = vector.broadcast %cst_10 : f32 to vector<16x128xf32>
    %46 = arith.select %17, %44, %45 : vector<16x128xi1>, vector<16x128xf32>
    %47 = arith.mulf %36, %41 : vector<16x128xf32>
    %cst_11 = arith.constant 0.000000e+00 : f32
    %48 = vector.broadcast %cst_11 : f32 to vector<16x128xf32>
    %49 = arith.select %17, %47, %48 : vector<16x128xi1>, vector<16x128xf32>
    %50 = vector.broadcast %2 : vector<1x128xi32> to vector<16x128xi32>
    %51 = arith.cmpi eq, %15, %50 : vector<16x128xi32>
    %52 = vector.extract_strided_slice %46 {offsets = [0, 0], sizes = [1, 128], strides = [1, 1]} : vector<16x128xf32> to vector<1x128xf32>
    %53 = vector.shape_cast %52 : vector<1x128xf32> to vector<1x128xf32>
    %54 = vector.broadcast %53 : vector<1x128xf32> to vector<16x128xf32>
    %55 = arith.select %51, %54, %46 : vector<16x128xi1>, vector<16x128xf32>
    %c0_12 = arith.constant 0 : index
    %c0_13 = arith.constant 0 : index
    %c0_14 = arith.constant 0 : index
    %56 = vector.load %arg4[%c0_12, %c0_13, %c0_14] : memref<2x16x128xf32, #tpu.memory_space<vmem>>, vector<1x16x128xf32>
    %57 = vector.shape_cast %56 : vector<1x16x128xf32> to vector<16x128xf32>
    %58 = vector.shape_cast %55 : vector<16x128xf32> to vector<1x16x128xf32>
    tpu.vector_store %arg4[%c0_12, %c0_13, %c0_14], %58 {strides = array<i32>} : memref<2x16x128xf32, #tpu.memory_space<vmem>>, vector<1x16x128xf32>,
    %59 = vector.extract_strided_slice %49 {offsets = [0, 0], sizes = [1, 128], strides = [1, 1]} : vector<16x128xf32> to vector<1x128xf32>
    %60 = vector.shape_cast %59 : vector<1x128xf32> to vector<1x128xf32>
    %61 = vector.broadcast %60 : vector<1x128xf32> to vector<16x128xf32>
    %62 = arith.select %51, %61, %49 : vector<16x128xi1>, vector<16x128xf32>
    %c1 = arith.constant 1 : index
    %c0_15 = arith.constant 0 : index
    %c0_16 = arith.constant 0 : index
    %63 = vector.load %arg4[%c1, %c0_15, %c0_16] : memref<2x16x128xf32, #tpu.memory_space<vmem>>, vector<1x16x128xf32>
    %64 = vector.shape_cast %63 : vector<1x16x128xf32> to vector<16x128xf32>
    %65 = vector.shape_cast %62 : vector<16x128xf32> to vector<1x16x128xf32>
    tpu.vector_store %arg4[%c1, %c0_15, %c0_16], %65 {strides = array<i32>} : memref<2x16x128xf32, #tpu.memory_space<vmem>>, vector<1x16x128xf32>,
    return
  }
  func.func @transform_0(%arg0: i32) -> (i32, i32) {
    %c0_i32 = arith.constant 0 : i32
    %c0_i32_0 = arith.constant 0 : i32
    return %c0_i32, %arg0 : i32, i32
  }
  func.func @transform_1(%arg0: i32) -> (i32, i32) {
    %c0_i32 = arith.constant 0 : i32
    %c0_i32_0 = arith.constant 0 : i32
    return %c0_i32, %arg0 : i32, i32
  }
  func.func @transform_2(%arg0: i32) -> (i32, i32) {
    %c0_i32 = arith.constant 0 : i32
    %c0_i32_0 = arith.constant 0 : i32
    return %c0_i32, %arg0 : i32, i32
  }
  func.func @transform_3(%arg0: i32) -> (i32, i32, i32) {
    %c0_i32 = arith.constant 0 : i32
    %c0_i32_0 = arith.constant 0 : i32
    %c0_i32_1 = arith.constant 0 : i32
    return %c0_i32, %c0_i32_0, %arg0 : i32, i32, i32
  }
}

</mosaic_0001>

<bundles_post_ra>
// kernel: tpu_custom_call.1
= control target key start
LH: loop header
LB: loop body
LE: loop exit
PB: predicated region body
PF: predicated region fallthrough
CT: control target
= control target key end

     0   :  { %8 = vsyncpa [#allocation3], 0  ;;  %s1553_s0 = inlined_call_operand.hbm [shape: f32[32,128], index: 0, kind: input, shape index: {}]   ;;  %s1554_s1 = inlined_call_operand.vmem [shape: s32[1,128], index: 1, kind: input, shape index: {}]   ;;  %s1555_s2 = inlined_call_operand.vmem [shape: f32[1,128], index: 2, kind: input, shape index: {}]   ;;  %s1556_s3 = inlined_call_operand.hbm [shape: f32[2,16,128], index: 3, kind: output, shape index: {}]  }
   0x1   :  { %9 = vsyncpa [#allocation4], 0  ;;  %s1110_s12 = smov [#allocation2]   ;;  %s1062_s16 = scalar_lea.hbm %s1553_s0, 512 }
   0x2   :  { %s15_s13 = sshll.u32 %s1110_s12, 4  ;;  %p1063_p0 = scmp.ne.s32.totalorder %s1553_s0, %s1062_s16  ;;  %s16_s13 = int_to_ptr.vmem [resolvable:$true] %s15_s13 }
   0x3   :  { %p1066_p1 = scmp.lt.u32.totalorder %s1062_s16, %s1553_s0 }
   0x5   :  { %p1068_p2 = pnand %p1066_p1, %p1063_p0 }
   0x7   :  { %1071 = shalt.err (!%p1068_p2)
}
   0x8   :  { %s1072_s21 = scalar_lea.vmem %s16_s13, 512  ;;  %p1077_p4 = scmp.lt.s32.totalorder %s16_s13, %s16_s13 }
   0x9   :  { %p1073_p3 = scmp.ne.s32.totalorder %s16_s13, %s1072_s21  ;;  %p1078_p5 = scmp.lt.s32.totalorder %s1072_s21, %s1072_s21 }
   0xb   :  { %p1079_p6 = por %p1078_p5, %p1077_p4 }
   0xd   :  { %p1080_p7 = pnand %p1079_p6, %p1073_p3 }
   0xf   :  { %1083 = shalt.err (!%p1080_p7)
}
  0x10   :  { %s1111_s22 = smov 128   ;;  %s1112_s23 = smov 8  }
  0x11   :  { %21 = dma.hbm_to_vmem [thread:$0]  %s1553_s0, 512, %s16_s13, [#allocation3], %s1111_s22, %s1111_s22, %s1112_s23  }
  0x12   :  { %1106 = dma.done.wait [#allocation3], 512  }
  0x13   :  { %1107 = vsyncadd [#allocation3], 4294966784  ;;  %v1155_v0 = vld [vmem:[#allocation2 + $0x10] sm:$0xff]  ;;  %v1157_v1 = vld [vmem:[#allocation2 + $0x18] sm:$0xff]  ;;  %v1113_v29 = vmov 683565275  }
  0x14   :  { %v35_v2 = vand.u32 2147483647, %v1155_v0  ;;  %v38_v3 = vand.u32 2139095040, %v1155_v0  ;;  %v138_v4 = vand.u32 2147483647, %v1157_v1  ;;  %v1162_v5 = vld [vmem:[#allocation2] sm:$0xff] }
  0x15   :  { %v141_v6 = vand.u32 2139095040, %v1157_v1  ;;  %v465_v12 = vand.u32 2139095040, %v1162_v5  ;;  %v1114_v31 = vmov 2475754826   ;;  %v1115_v33 = vmov 2131351028  }
  0x16   :  { %v39_v7 = vshrl.u32 %v38_v3, 23  ;;  %v42_v8 = vand.u32 8388607, %v35_v2  ;;  %v145_v10 = vand.u32 8388607, %v138_v4 }
  0x17   :  { %v142_v9 = vshrl.u32 %v141_v6, 23  ;;  %v466_v15 = vshrl.u32 %v465_v12, 23  ;;  %v1116_v35 = vmov 2102212464   ;;  %v1117_v37 = vmov 920167782  }
  0x18   :  { %v979_v11 = vadd.s32 4294967169, %v39_v7  ;;  %v43_v16 = vor.u32 8388608, %v42_v8  ;;  %v146_v17 = vor.u32 8388608, %v145_v10  ;;  %v1118_v45 = vmov 1326507024  }
  0x19   :  { %v983_v13 = vadd.s32 4294967169, %v142_v9  ;;  %v995_v19 = vadd.s32 4294967169, %v466_v15 }
  0x1a   :  { %v45_v14 = vadd.s32 1, %v979_v11  ;;  %v1170_v24 = vshll.u32 %v43_v16, 8  ;;  %v1172_v26 = vshll.u32 %v146_v17, 8 }
  0x1b   :  { %v148_v18 = vadd.s32 1, %v983_v13  ;;  %v1174_v27 = vadd.s32 1, %v995_v19 }
  0x1c   :  { %vm46_vm0 = vcmp.gt.s32.totalorder %v45_v14, 0 }
  0x1d   :  { %v47_v20 = vsel %vm46_vm0, %v45_v14, 0  ;;  %vm149_vm1 = vcmp.gt.s32.totalorder %v148_v18, 0  ;;  %vm473_vm11 = vcmp.gt.s32.totalorder %v1174_v27, 0 }
  0x1e   :  { %v48_v21 = vshrl.u32 %v47_v20, 5  ;;  %v49_v22 = vand.u32 31, %v47_v20  ;;  %v150_v23 = vsel %vm149_vm1, %v148_v18, 0 }
  0x1f   :  { %v152_v25 = vand.u32 31, %v150_v23  ;;  %v1181_v39 = vshrl.u32 %v150_v23, 5 }
  0x20   :  { %v50_v28 = vsub.s32 32, %v49_v22  ;;  %v52_v30 = vshll.u32 %v1113_v29, %v49_v22  ;;  %v55_v32 = vshll.u32 %v1114_v31, %v49_v22  ;;  %v58_v34 = vshll.u32 %v1115_v33, %v49_v22 }
  0x21   :  { %v61_v36 = vshll.u32 %v1116_v35, %v49_v22  ;;  %v64_v38 = vshll.u32 %v1117_v37, %v49_v22  ;;  %vm67_vm2 = vcmp.lt.s32.totalorder %v48_v21, 1  ;;  %vm68_vm3 = vcmp.lt.s32.totalorder %v48_v21, 2 }
  0x22   :  { %v51_v40 = vshrl.u32 %v1113_v29, %v50_v28  ;;  %v53_v41 = vshrl.u32 %v1114_v31, %v50_v28  ;;  %v56_v42 = vshrl.u32 %v1115_v33, %v50_v28  ;;  %v59_v43 = vshrl.u32 %v1116_v35, %v50_v28 }
  0x23   :  { %v62_v44 = vshrl.u32 %v1117_v37, %v50_v28  ;;  %v65_v46 = vshrl.u32 %v1118_v45, %v50_v28  ;;  %vm70_vm4 = vcmp.lt.s32.totalorder %v48_v21, 4  ;;  %v153_v50 = vsub.s32 32, %v152_v25 }
  0x24   :  { %v54_v47 = vor.u32 %v53_v41, %v52_v30  ;;  %v57_v48 = vor.u32 %v56_v42, %v55_v32  ;;  %v60_v49 = vor.u32 %v59_v43, %v58_v34  ;;  %vm69_vm5 = vcmp.lt.s32.totalorder %v48_v21, 3 }
  0x25   :  { %v63_v51 = vor.u32 %v62_v44, %v61_v36  ;;  %v66_v52 = vor.u32 %v65_v46, %v64_v38  ;;  %v155_v53 = vshll.u32 %v1113_v29, %v152_v25  ;;  %v158_v61 = vshll.u32 %v1114_v31, %v152_v25 }
  0x26   :  { %v71_v54 = vsel %vm67_vm2, %v51_v40, %v54_v47  ;;  %v72_v55 = vsel %vm70_vm4, %v60_v49, 2102212464  ;;  %v75_v56 = vsel %vm67_vm2, %v54_v47, %v57_v48  ;;  %v79_v57 = vsel %vm67_vm2, %v57_v48, %v60_v49 }
  0x27   :  { %v73_v58 = vsel %vm69_vm5, %v57_v48, %v72_v55  ;;  %v76_v59 = vsel %vm70_vm4, %v63_v51, 920167782  ;;  %v80_v60 = vsel %vm70_vm4, %v66_v52, 1326507024  ;;  %v154_v3 = vshrl.u32 %v1113_v29, %v153_v50 }
  0x28   :  { %v77_v62 = vsel %vm69_vm5, %v60_v49, %v76_v59  ;;  %v81_v63 = vsel %vm69_vm5, %v63_v51, %v80_v60  ;;  %v156_v6 = vshrl.u32 %v1114_v31, %v153_v50  ;;  %v74_v7 = vsel %vm68_vm3, %v71_v54, %v73_v58 }
  0x29   :  { %v78_v8 = vsel %vm68_vm3, %v75_v56, %v77_v62  ;;  %v82_v9 = vsel %vm68_vm3, %v79_v57, %v81_v63  ;;  %v159_v10 = vshrl.u32 %v1115_v33, %v153_v50  ;;  %v161_v17 = vshll.u32 %v1115_v33, %v152_v25 }
  0x2a   :  { %v1201_v11 = vmul.u32.u64.low %v1170_v24, %v82_v9  ;;  %v1202_v12 = vmul.u32.u64.high %v1170_v24, %v82_v9, %v1201_v11  ;;  %v1205_v13 = vmul.u32.u64.low %v1170_v24, %v78_v8  ;;  %v1206_v14 = vmul.u32.u64.high %v1170_v24, %v78_v8, %v1205_v13 }
  0x2b   :  { %v157_v15 = vor.u32 %v156_v6, %v155_v53  ;;  %v160_v16 = vor.u32 %v159_v10, %v158_v61  ;;  %v162_v18 = vshrl.u32 %v1116_v35, %v153_v50  ;;  %v164_v19 = vshll.u32 %v1116_v35, %v152_v25  ;;  %v1258_v10 = vld [vmem:[#allocation2 + $0x8] sm:$0xff] }
  0x2c   :  { %v165_v20 = vshrl.u32 %v1117_v37, %v153_v50  ;;  %v167_v21 = vshll.u32 %v1117_v37, %v152_v25  ;;  %v168_v22 = vshrl.u32 %v1118_v45, %v153_v50  ;;  %v90_v23 = vmul.u32 %v1170_v24, %v74_v7 }
  0x2d   :  { %v163_v28 = vor.u32 %v162_v18, %v161_v17  ;;  %vm170_vm6 = vcmp.lt.s32.totalorder %v1181_v39, 1  ;;  %vm171_vm7 = vcmp.lt.s32.totalorder %v1181_v39, 2  ;;  %vm92_vm8 = vc.u32 %v1202_v12, %v1205_v13 }
  0x2e   :  { %v93_v30 = vadd.s32 1, %v1206_v14  ;;  %v166_v32 = vor.u32 %v165_v20, %v164_v19  ;;  %vm172_vm9 = vcmp.lt.s32.totalorder %v1181_v39, 3  ;;  %v169_v34 = vor.u32 %v168_v22, %v167_v21 }
  0x2f   :  { %vm173_vm10 = vcmp.lt.s32.totalorder %v1181_v39, 4  ;;  %v174_v25 = vsel %vm170_vm6, %v154_v3, %v157_v15  ;;  %v178_v36 = vsel %vm170_vm6, %v157_v15, %v160_v16  ;;  %v182_v41 = vsel %vm170_vm6, %v160_v16, %v163_v28 }
  0x30   :  { %v94_v24 = vsel %vm92_vm8, %v93_v30, %v1206_v14  ;;  %v175_v38 = vsel %vm173_vm10, %v163_v28, 2102212464  ;;  %v179_v40 = vsel %vm173_vm10, %v166_v32, 920167782  ;;  %v183_v46 = vsel %vm173_vm10, %v169_v34, 1326507024 }
  0x31   :  { %v95_v42 = vadd.s32 %v94_v24, %v90_v23  ;;  %v176_v43 = vsel %vm172_vm9, %v160_v16, %v175_v38  ;;  %v180_v44 = vsel %vm172_vm9, %v163_v28, %v179_v40  ;;  %v184_v49 = vsel %vm172_vm9, %v166_v32, %v183_v46 }
  0x32   :  { %v177_v47 = vsel %vm171_vm7, %v174_v25, %v176_v43  ;;  %v181_v48 = vsel %vm171_vm7, %v178_v36, %v180_v44  ;;  %v185_v51 = vsel %vm171_vm7, %v182_v41, %v184_v49  ;;  %v474_v56 = vsel %vm473_vm11, %v1174_v27, 0 }
  0x33   :  { %v96_v50 = vadd.s32 536870912, %v95_v42  ;;  %v1232_v52 = vmul.u32.u64.low %v1172_v26, %v181_v48  ;;  %v1233_v53 = vmul.u32.u64.high %v1172_v26, %v181_v48, %v1232_v52  ;;  %v193_v58 = vmul.u32 %v1172_v26, %v177_v47 }
  0x34   :  { %v1237_v54 = vmul.u32.u64.low %v1172_v26, %v185_v51  ;;  %v1238_v55 = vmul.u32.u64.high %v1172_v26, %v185_v51, %v1237_v54  ;;  %v476_v60 = vand.u32 31, %v474_v56  ;;  %v462_v63 = vand.u32 2147483647, %v1162_v5 }
  0x35   :  { %v1241_v57 = vshrl.u32 %v96_v50, 30  ;;  %v196_v39 = vadd.s32 1, %v1233_v53  ;;  %v475_v22 = vshrl.u32 %v474_v56, 5  ;;  %v569_v32 = vand.u32 2139095040, %v1258_v10 }
  0x36   :  { %vm195_vm12 = vc.u32 %v1238_v55, %v1232_v52  ;;  %v477_v6 = vsub.s32 32, %v476_v60  ;;  %v469_v8 = vand.u32 8388607, %v462_v63  ;;  %v479_v14 = vshll.u32 %v1113_v29, %v476_v60 }
  0x37   :  { %v98_v59 = vshll.u32 %v1241_v57, 30  ;;  %v197_v62 = vsel %vm195_vm12, %v196_v39, %v1233_v53  ;;  %v482_v16 = vshll.u32 %v1114_v31, %v476_v60  ;;  %v488_v19 = vshll.u32 %v1116_v35, %v476_v60 }
  0x38   :  { %v198_v3 = vadd.s32 %v197_v62, %v193_v58  ;;  %v480_v15 = vshrl.u32 %v1114_v31, %v477_v6  ;;  %v483_v18 = vshrl.u32 %v1115_v33, %v477_v6  ;;  %v489_v20 = vshrl.u32 %v1117_v37, %v477_v6 }
  0x39   :  { %v1248_v61 = vsub.s32 %v95_v42, %v98_v59  ;;  %v470_v21 = vor.u32 8388608, %v469_v8  ;;  %v485_v28 = vshll.u32 %v1115_v33, %v476_v60  ;;  %v486_v30 = vshrl.u32 %v1116_v35, %v477_v6 }
  0x3a   :  { %v199_v7 = vadd.s32 536870912, %v198_v3  ;;  %v491_v25 = vshll.u32 %v1117_v37, %v476_v60  ;;  %v492_v36 = vshrl.u32 %v1118_v45, %v477_v6  ;;  %v481_v38 = vor.u32 %v480_v15, %v479_v14 }
  0x3b   :  { %v101_v27 = vsub.s32 0, %v1248_v61  ;;  %v484_v40 = vor.u32 %v483_v18, %v482_v16  ;;  %v490_v41 = vor.u32 %v489_v20, %v488_v19  ;;  %vm494_vm13 = vcmp.lt.s32.totalorder %v475_v22, 1 }
  0x3c   :  { %v1256_v9 = vshrl.u32 %v199_v7, 30  ;;  %vm497_vm14 = vcmp.lt.s32.totalorder %v475_v22, 4  ;;  %v510_v42 = vshll.u32 %v470_v21, 8  ;;  %v478_v44 = vshrl.u32 %v1113_v29, %v477_v6 }
  0x3d   :  { %v980_v26 = vmin.u32 %v101_v27, %v1248_v61  ;;  %v487_v46 = vor.u32 %v486_v30, %v485_v28  ;;  %v570_v47 = vshrl.u32 %v569_v32, 23  ;;  %v493_v48 = vor.u32 %v492_v36, %v491_v25 }
  0x3e   :  { %v201_v17 = vshll.u32 %v1256_v9, 30  ;;  %vm495_vm0 = vcmp.lt.s32.totalorder %v475_v22, 2  ;;  %vm496_vm1 = vcmp.lt.s32.totalorder %v475_v22, 3  ;;  %v502_v51 = vsel %vm494_vm13, %v481_v38, %v484_v40 }
  0x3f   :  { %v103_v11 = vclz %v980_v26  ;;  %v499_v50 = vsel %vm497_vm14, %v487_v46, 2102212464  ;;  %v503_v53 = vsel %vm497_vm14, %v490_v41, 920167782  ;;  %v999_v58 = vadd.s32 4294967169, %v570_v47 }
  0x40   :  { %v1267_v23 = vsub.s32 %v198_v3, %v201_v17  ;;  %v504_v56 = vsel %vm496_vm1, %v487_v46, %v503_v53  ;;  %v498_v59 = vsel %vm494_vm13, %v478_v44, %v481_v38  ;;  %v500_v39 = vsel %vm496_vm1, %v484_v40, %v499_v50 }
  0x41   :  { %v981_v34 = vadd.s32 4294967294, %v103_v11  ;;  %v505_v60 = vsel %vm495_vm0, %v502_v51, %v504_v56  ;;  %v506_v62 = vsel %vm494_vm13, %v484_v40, %v487_v46  ;;  %v507_v27 = vsel %vm497_vm14, %v493_v48, 1326507024 }
  0x42   :  { %v204_v24 = vsub.s32 0, %v1267_v23  ;;  %v1284_v6 = vmul.u32.u64.low %v510_v42, %v505_v60  ;;  %v1285_v7 = vmul.u32.u64.high %v510_v42, %v505_v60, %v1284_v6  ;;  %v508_v26 = vsel %vm496_vm1, %v490_v41, %v507_v27 }
  0x43   :  { %vm982_vm15 = vcmp.lt.s32.totalorder %v981_v34, 0  ;;  %v501_v8 = vsel %vm495_vm0, %v498_v59, %v500_v39  ;;  %v509_v11 = vsel %vm495_vm0, %v506_v62, %v508_v26  ;;  %v576_v17 = vadd.s32 1, %v999_v58 }
  0x44   :  { %v984_v43 = vmin.u32 %v204_v24, %v1267_v23  ;;  %v106_v54 = vsel %vm982_vm15, 0, %v981_v34  ;;  %v1290_v15 = vmul.u32.u64.low %v510_v42, %v509_v11  ;;  %v1291_v16 = vmul.u32.u64.high %v510_v42, %v509_v11, %v1290_v15 }
  0x45   :  { %v111_v14 = vsub.s32 4294967266, %v106_v54  ;;  %v520_v18 = vadd.s32 1, %v1285_v7  ;;  %v517_v19 = vmul.u32 %v510_v42, %v501_v8  ;;  %v566_v20 = vand.u32 2147483647, %v1258_v10 }
  0x46   :  { %v206_v49 = vclz %v984_v43  ;;  %vm577_vm3 = vcmp.gt.s32.totalorder %v576_v17, 0  ;;  %v91_v21 = vadd.s32 %v1205_v13, %v1202_v12  ;;  %v107_v28 = vsub.s32 32, %v106_v54 }
  0x47   :  { %v578_v30 = vsel %vm577_vm3, %v576_v17, 0  ;;  %v112_v32 = vadd.s32 127, %v111_v14  ;;  %vm519_vm4 = vc.u32 %v1291_v16, %v1284_v6  ;;  %v573_v36 = vand.u32 8388607, %v566_v20 }
  0x48   :  { %v985_v3 = vadd.s32 4294967294, %v206_v49  ;;  %v521_v34 = vsel %vm519_vm4, %v520_v18, %v1285_v7  ;;  %v580_v24 = vand.u32 31, %v578_v30  ;;  %v108_v38 = vshll.u32 %v1248_v61, %v106_v54 }
  0x49   :  { %v522_v25 = vadd.s32 %v521_v34, %v517_v19  ;;  %v109_v40 = vshrl.u32 %v91_v21, %v107_v28  ;;  %v194_v12 = vadd.s32 %v1232_v52, %v1238_v55  ;;  %v113_v41 = vshll.u32 %v112_v32, 23 }
  0x4a   :  { %vm986_vm2 = vcmp.lt.s32.totalorder %v985_v3, 0  ;;  %v581_v44 = vsub.s32 32, %v580_v24  ;;  %v1305_v46 = vshrl.u32 %v578_v30, 5  ;;  %v583_v47 = vshll.u32 %v1113_v29, %v580_v24 }
  0x4b   :  { %v209_v22 = vsel %vm986_vm2, 0, %v985_v3  ;;  %v523_v43 = vadd.s32 536870912, %v522_v25  ;;  %v586_v48 = vshll.u32 %v1114_v31, %v580_v24  ;;  %v592_v49 = vshll.u32 %v1116_v35, %v580_v24 }
  0x4c   :  { %v214_v13 = vsub.s32 4294967266, %v209_v22  ;;  %v210_v42 = vsub.s32 32, %v209_v22  ;;  %v584_v61 = vshrl.u32 %v1114_v31, %v581_v44  ;;  %v587_v51 = vshrl.u32 %v1115_v33, %v581_v44 }
  0x4d   :  { %v1310_v50 = vshrl.u32 %v523_v43, 30  ;;  %v589_v52 = vshll.u32 %v1115_v33, %v580_v24  ;;  %v110_v55 = vor.u32 %v109_v40, %v108_v38  ;;  %v590_v54 = vshrl.u32 %v1116_v35, %v581_v44 }
  0x4e   :  { %v215_v53 = vadd.s32 127, %v214_v13  ;;  %v593_v56 = vshrl.u32 %v1117_v37, %v581_v44  ;;  %v114_v58 = vor.u32 4788187, %v113_v41  ;;  %v211_v59 = vshll.u32 %v1267_v23, %v209_v22 }
  0x4f   :  { %v212_v39 = vshrl.u32 %v194_v12, %v210_v42  ;;  %v525_v60 = vshll.u32 %v1310_v50, 30  ;;  %v585_v62 = vor.u32 %v584_v61, %v583_v47  ;;  %v595_v31 = vshll.u32 %v1117_v37, %v580_v24 }
  0x50   :  { %v594_v3 = vor.u32 %v593_v56, %v592_v49  ;;  %v596_v27 = vshrl.u32 %v1118_v45, %v581_v44  ;;  %v588_v33 = vor.u32 %v587_v51, %v586_v48  ;;  %v591_v26 = vor.u32 %v590_v54, %v589_v52 }
  0x51   :  { %v526_v7 = vsub.s32 %v522_v25, %v525_v60  ;;  %vm601_vm5 = vcmp.lt.s32.totalorder %v1305_v46, 4  ;;  %v216_v35 = vshll.u32 %v215_v53, 23  ;;  %vm598_vm6 = vcmp.lt.s32.totalorder %v1305_v46, 1 }
  0x52   :  { %vm600_vm7 = vcmp.lt.s32.totalorder %v1305_v46, 3  ;;  %v117_v23 = vcvt.s32.f32 %v110_v55  ;;  %v574_v11 = vor.u32 8388608, %v573_v36  ;;  %v115_v14 = vand.u32 2147483647, %v114_v58 }
  0x53   :  { %v528_v8 = vsub.s32 0, %v526_v7  ;;  %v213_v15 = vor.u32 %v212_v39, %v211_v59  ;;  %vm599_vm8 = vcmp.lt.s32.totalorder %v1305_v46, 2  ;;  %v607_v37 = vsel %vm601_vm5, %v594_v3, 920167782 }
  0x54   :  { %v597_v17 = vor.u32 %v596_v27, %v595_v31  ;;  %v606_v18 = vsel %vm598_vm6, %v585_v62, %v588_v33  ;;  %v608_v19 = vsel %vm600_vm7, %v591_v26, %v607_v37  ;;  %v217_v21 = vor.u32 4788187, %v216_v35 }
  0x55   :  { %v996_v45 = vmin.u32 %v528_v8, %v526_v7  ;;  %v582_v28 = vshrl.u32 %v1113_v29, %v581_v44  ;;  %v603_v32 = vsel %vm601_vm5, %v591_v26, 2102212464  ;;  %v614_v22 = vshll.u32 %v574_v11, 8 }
  0x56   :  { %v118_v34 = vmul.f32 %v117_v23, %v115_v14  ;;  %v609_v25 = vsel %vm599_vm8, %v606_v18, %v608_v19  ;;  %v610_v36 = vsel %vm598_vm6, %v588_v33, %v591_v26  ;;  %v220_v24 = vcvt.s32.f32 %v213_v15 }
  0x57   :  { %v530_v30 = vclz %v996_v45  ;;  %v518_v38 = vadd.s32 %v1284_v6, %v1291_v16  ;;  %v611_v29 = vsel %vm601_vm5, %v597_v17, 1326507024  ;;  %v218_v12 = vand.u32 2147483647, %v217_v21 }
  0x58   :  { %v602_v13 = vsel %vm598_vm6, %v582_v28, %v585_v62  ;;  %v604_v41 = vsel %vm600_vm7, %v588_v33, %v603_v32  ;;  %v612_v42 = vsel %vm600_vm7, %v594_v3, %v611_v29  ;;  %vm37_vm10 = vcmp.lt.s32.totalorder %v1155_v0, 0 }
  0x59   :  { %v997_v40 = vadd.s32 4294967294, %v530_v30  ;;  %v613_v43 = vsel %vm599_vm8, %v610_v36, %v612_v42  ;;  %v1350_v44 = vmul.u32.u64.low %v614_v22, %v609_v25  ;;  %v1351_v6 = vmul.u32.u64.high %v614_v22, %v609_v25, %v1350_v44 }
  0x5a   :  { %v1354_v47 = vmul.u32.u64.low %v614_v22, %v613_v43  ;;  %v1355_v48 = vmul.u32.u64.high %v614_v22, %v613_v43, %v1354_v47  ;;  %v119_v51 = vxor.u32 2147483648, %v118_v34  ;;  %v605_v52 = vsel %vm599_vm8, %v602_v13, %v604_v41 }
  0x5b   :  { %vm998_vm9 = vcmp.lt.s32.totalorder %v997_v40, 0  ;;  %v221_v55 = vmul.f32 %v220_v24, %v218_v12  ;;  %v621_v59 = vmul.u32 %v614_v22, %v605_v52  ;;  %vm1364_vm12 = vcmp.le.f32.partialorder %v35_v2, 0.7853982 }
  0x5c   :  { %v533_v16 = vsel %vm998_vm9, 0, %v997_v40  ;;  %vm623_vm11 = vc.u32 %v1355_v48, %v1350_v44  ;;  %v120_v60 = vsel %vm37_vm10, %v119_v51, %v118_v34  ;;  %v624_v46 = vadd.s32 1, %v1351_v6 }
  0x5d   :  { %v534_v49 = vsub.s32 32, %v533_v16  ;;  %v538_v61 = vsub.s32 4294967266, %v533_v16  ;;  %v535_v53 = vshll.u32 %v526_v7, %v533_v16  ;;  %v222_v62 = vxor.u32 2147483648, %v221_v55 }
  0x5e   :  { %v121_v27 = vsub.s32 4, %v1241_v57  ;;  %vm140_vm13 = vcmp.lt.s32.totalorder %v1157_v1, 0  ;;  %v625_v7 = vsel %vm623_vm11, %v624_v46, %v1351_v6  ;;  %v123_v2 = vsel %vm1364_vm12, %v1155_v0, %v120_v60 }
  0x5f   :  { %v536_v54 = vshrl.u32 %v518_v38, %v534_v49  ;;  %v539_v56 = vadd.s32 127, %v538_v61  ;;  %v626_v33 = vadd.s32 %v625_v7, %v621_v59  ;;  %vm1379_vm14 = vcmp.le.f32.partialorder %v138_v4, 0.7853982 }
  0x60   :  { %v223_v35 = vsel %vm140_vm13, %v222_v62, %v221_v55  ;;  %v122_v14 = vsel %vm37_vm10, %v121_v27, %v1241_v57  ;;  %1038 = vcosq.f32 %v123_v2  ;;  %v224_v37 = vsub.s32 4, %v1256_v9 }
  0x61   :  { %v540_v58 = vshll.u32 %v539_v56, 23  ;;  %v537_v3 = vor.u32 %v536_v54, %v535_v53  ;;  %v627_v11 = vadd.s32 536870912, %v626_v33  ;;  %1040 = vsinq.f32 %v123_v2 }
  0x62   :  { %v226_v4 = vsel %vm1379_vm14, %v1157_v1, %v223_v35  ;;  %v124_v45 = vsel %vm1364_vm12, 0, %v122_v14  ;;  %v225_v57 = vsel %vm140_vm13, %v224_v37, %v1256_v9  ;;  %vm464_vm15 = vcmp.lt.s32.totalorder %v1162_v5, 0 }
  0x63   :  { %v541_v31 = vor.u32 4788187, %v540_v58  ;;  %v544_v8 = vcvt.s32.f32 %v537_v3  ;;  %v1388_v15 = vshrl.u32 %v627_v11, 30  ;;  %1042 = vcosq.f32 %v226_v4 }
  0x64   :  { %1044 = vsinq.f32 %v226_v4  ;;  %v343_v21 = vadd.s32 3, %v124_v45  ;;  %v227_v32 = vsel %vm1379_vm14, 0, %v225_v57  ;;  %vm1409_vm0 = vcmp.le.f32.partialorder %v462_v63, 0.7853982 }
  0x65   :  { %v542_v23 = vand.u32 2147483647, %v541_v31  ;;  %v629_v18 = vshll.u32 %v1388_v15, 30  ;;  %v548_v38 = vsub.s32 4, %v1310_v50  ;;  %v243_v29 = vlaneseq }
  0x66   :  { %v344_v25 = vand.u32 3, %v343_v21  ;;  %v447_v12 = vadd.s32 3, %v227_v32  ;;  %v622_v16 = vadd.s32 %v1350_v44, %v1355_v48  ;;  %v34_v48 = vld [vmem:[%s1555_s2] sm:$0x1]  ;;  %v128_v60 = vand.u32 3, %v124_v45 }
  0x67   :  { %v545_v17 = vmul.f32 %v544_v8, %v542_v23  ;;  %v630_v19 = vsub.s32 %v626_v33, %v629_v18  ;;  %v549_v6 = vsel %vm464_vm15, %v548_v38, %v1310_v50  ;;  %v1430_v49 = vshrl.u32 %v243_v29, 7 }
  0x68   :  { %vm346_vm1 = vcmp.eq.s32.totalorder %v344_v25, 0  ;;  %vm349_vm2 = vcmp.eq.s32.totalorder %v344_v25, 2  ;;  %vm345_vm4 = vcmp.lt.s32.totalorder %v344_v25, 2  ;;  %v448_v61 = vand.u32 3, %v447_v12 }
  0x69   :  { %v546_v28 = vxor.u32 2147483648, %v545_v17  ;;  %v632_v30 = vsub.s32 0, %v630_v19  ;;  %v551_v44 = vsel %vm1409_vm0, 0, %v549_v6  ;;  %vm127_vm7 = vweird.f32 %v1155_v0  ;;  %v33_v0 = vld [vmem:[%s1554_s1] sm:$0x1]  ;;  %s1119_s1 = smov [#allocation5]  }
  0x6a   :  { %v1403_v34 = vpop.eup %1038  ;;  %vm450_vm5 = vcmp.eq.s32.totalorder %v448_v61, 0  ;;  %vm453_vm6 = vcmp.eq.s32.totalorder %v448_v61, 2  ;;  %v241_v31 = vmul.f32 -1.6, %v34_v48  ;;  %v1445_v27 = vsub.s32 0, %v1430_v49  ;;  %s967_s28 = sshll.u32 %s1119_s1, 4  ;;  %s968_s28 = int_to_ptr.vmem [resolvable:$true] %s967_s28 }
  0x6b   :  { %v1000_v22 = vmin.u32 %v632_v30, %v630_v19  ;;  %v1405_v36 = vpop.eup %1040  ;;  %v547_v9 = vsel %vm464_vm15, %v546_v28, %v545_v17  ;;  %v134_v42 = vxor.u32 2147483648, %v1403_v34  ;;  %vm449_vm8 = vcmp.lt.s32.totalorder %v448_v61, 2  ;;  %s1084_s29 = scalar_lea.vmem %s968_s28, 512  ;;  %p1089_p9 = scmp.lt.s32.totalorder %s968_s28, %s968_s28 }
  0x6c   :  { %v131_v41 = vxor.u32 2147483648, %v1405_v36  ;;  %v550_v63 = vsel %vm1409_vm0, %v1162_v5, %v547_v9  ;;  %v555_v7 = vadd.s32 3, %v551_v44  ;;  %vm130_vm9 = vcmp.eq.s32.totalorder %v128_v60, 0  ;;  %p1085_p8 = scmp.ne.s32.totalorder %s968_s28, %s1084_s29  ;;  %p1090_p10 = scmp.lt.s32.totalorder %s1084_s29, %s1084_s29 }
  0x6d   :  { %v634_v40 = vclz %v1000_v22  ;;  %v1421_v43 = vpop.eup %1042  ;;  %1046 = vcosq.f32 %v550_v63  ;;  %v351_v50 = vsel %vm349_vm2, %v134_v42, %v1405_v36  ;;  %vm133_vm10 = vcmp.eq.s32.totalorder %v128_v60, 2 }
  0x6e   :  { %v1428_v47 = vpop.eup %1044  ;;  %v348_v54 = vsel %vm346_vm1, %v1403_v34, %v131_v41  ;;  %1048 = vsinq.f32 %v550_v63  ;;  %v237_v58 = vxor.u32 2147483648, %v1421_v43  ;;  %v652_v8 = vsub.s32 4, %v1388_v15  ;;  %p1091_p11 = por %p1090_p10, %p1089_p9 }
  0x6f   :  { %v1001_v13 = vadd.s32 4294967294, %v634_v40  ;;  %v234_v56 = vxor.u32 2147483648, %v1428_v47  ;;  %v352_v46 = vsel %vm345_vm4, %v348_v54, %v351_v50  ;;  %vm230_vm11 = vweird.f32 %v1157_v1 }
  0x70   :  { %v455_v33 = vsel %vm453_vm6, %v237_v58, %v1428_v47  ;;  %v353_v23 = vsel %vm127_vm7, nan, %v352_v46  ;;  %v231_v11 = vand.u32 3, %v227_v32  ;;  %vm129_vm12 = vcmp.lt.s32.totalorder %v128_v60, 2  ;;  %p1092_p12 = pnand %p1091_p11, %p1085_p8 }
  0x71   :  { %vm1002_vm3 = vcmp.lt.s32.totalorder %v1001_v13, 0  ;;  %v452_v2 = vsel %vm450_vm5, %v1421_v43, %v234_v56  ;;  %v556_v4 = vand.u32 3, %v555_v7  ;;  %vm568_vm13 = vcmp.lt.s32.totalorder %v1258_v10, 0 }
  0x72   :  { %v637_v51 = vsel %vm1002_vm3, 0, %v1001_v13  ;;  %v456_v37 = vsel %vm449_vm8, %v452_v2, %v455_v33  ;;  %v132_v17 = vsel %vm130_vm9, %v1403_v34, %v131_v41  ;;  %v135_v18 = vsel %vm133_vm10, %v134_v42, %v1405_v36 }
  0x73   :  { %v638_v52 = vsub.s32 32, %v637_v51  ;;  %v639_v55 = vshll.u32 %v630_v19, %v637_v51  ;;  %v642_v53 = vsub.s32 4294967266, %v637_v51  ;;  %1050 = vrcp.f32 %v353_v23 }
  0x74   :  { %v246_v21 = vrot.slane %v241_v31, %v1445_v27  ;;  %vm1459_vm14 = vcmp.le.f32.partialorder %v566_v20, 0.7853982  ;;  %v653_v30 = vsel %vm568_vm13, %v652_v8, %v1388_v15  ;;  %v765_v32 = vand.u32 3, %v551_v44 }
  0x75   :  { %v640_v59 = vshrl.u32 %v622_v16, %v638_v52  ;;  %v643_v39 = vadd.s32 127, %v642_v53  ;;  %vm232_vm15 = vcmp.lt.s32.totalorder %v231_v11, 2  ;;  %vm233_vm0 = vcmp.eq.s32.totalorder %v231_v11, 0 }
  0x76   :  { %v457_v22 = vsel %vm230_vm11, nan, %v456_v37  ;;  %v136_v25 = vsel %vm129_vm12, %v132_v17, %v135_v18  ;;  %vm236_vm1 = vcmp.eq.s32.totalorder %v231_v11, 2  ;;  %vm558_vm2 = vcmp.eq.s32.totalorder %v556_v4, 0 }
  0x77   :  { %v641_v62 = vor.u32 %v640_v59, %v639_v55  ;;  %v644_v3 = vshll.u32 %v643_v39, 23  ;;  %v1047_v45 = vpop.eup %1046  ;;  %vm561_vm3 = vcmp.eq.s32.totalorder %v556_v4, 2  ;;  %v655_v15 = vsel %vm1459_vm14, 0, %v653_v30 }
  0x78   :  { %v1049_v57 = vpop.eup %1048  ;;  %v562_v36 = vxor.u32 2147483648, %v1047_v45  ;;  %1052 = vrcp.f32 %v457_v22  ;;  %vm767_vm4 = vcmp.eq.s32.totalorder %v765_v32, 0  ;;  %vm770_vm5 = vcmp.eq.s32.totalorder %v765_v32, 2 }
  0x79   :  { %v645_v26 = vor.u32 4788187, %v644_v3  ;;  %v648_v35 = vcvt.s32.f32 %v641_v62  ;;  %v559_v20 = vxor.u32 2147483648, %v1049_v57  ;;  %v137_v38 = vsel %vm127_vm7, nan, %v136_v25 }
  0x7a   :  { %v235_v40 = vsel %vm233_vm0, %v1421_v43, %v234_v56  ;;  %v238_v29 = vsel %vm236_vm1, %v237_v58, %v1428_v47  ;;  %vm557_vm6 = vcmp.lt.s32.totalorder %v556_v4, 2  ;;  %v659_v12 = vadd.s32 3, %v655_v15 }
  0x7b   :  { %v646_v14 = vand.u32 2147483647, %v645_v26  ;;  %vm766_vm8 = vcmp.lt.s32.totalorder %v765_v32, 2  ;;  %v560_v13 = vsel %vm558_vm2, %v1047_v45, %v559_v20  ;;  %v563_v41 = vsel %vm561_vm3, %v562_v36, %v1049_v57 }
  0x7c   :  { %v769_v42 = vsel %vm767_vm4, %v1047_v45, %v559_v20  ;;  %v772_v63 = vsel %vm770_vm5, %v562_v36, %v1049_v57  ;;  %v239_v6 = vsel %vm232_vm15, %v235_v40, %v238_v29  ;;  %v248_v43 = vmul.f32 %v246_v21, %v137_v38 }
  0x7d   :  { %v649_v19 = vmul.f32 %v648_v35, %v646_v14  ;;  %v1051_v16 = vpop.eup %1050  ;;  %vm554_vm7 = vweird.f32 %v1162_v5  ;;  %v564_v47 = vsel %vm557_vm6, %v560_v13, %v563_v41  ;;  %v773_v61 = vsel %vm766_vm8, %v769_v42, %v772_v63 }
  0x7e   :  { %v240_v51 = vsel %vm230_vm11, nan, %v239_v6  ;;  %v660_v52 = vand.u32 3, %v659_v12  ;;  %v868_v55 = vand.u32 3, %v655_v15  ;;  %v1491_v53 = vrot.slane %v33_v0, %v1445_v27 }
  0x7f   :  { %v650_v34 = vxor.u32 2147483648, %v649_v19  ;;  %v459_v54 = vmul.f32 %v1051_v16, %v248_v43  ;;  %v565_v50 = vsel %vm554_vm7, nan, %v564_v47  ;;  %v774_v44 = vsel %vm554_vm7, nan, %v773_v61 }
  0x80   :  { %v249_v56 = vmul.f32 %v246_v21, %v240_v51  ;;  %v1494_v58 = vadd.s32 8, %v1430_v49  ;;  %vm665_vm9 = vcmp.eq.s32.totalorder %v660_v52, 2  ;;  %vm870_vm10 = vcmp.eq.s32.totalorder %v868_v55, 0 }
  0x81   :  { %v651_v24 = vsel %vm568_vm13, %v650_v34, %v649_v19  ;;  %vm873_vm12 = vcmp.eq.s32.totalorder %v868_v55, 2  ;;  %vm887_vm11 = vcmp.lt.s32.totalorder %v1430_v49, %v1491_v53  ;;  %vm662_vm13 = vcmp.eq.s32.totalorder %v660_v52, 0 }
  0x82   :  { %v654_v9 = vsel %vm1459_vm14, %v1258_v10, %v651_v24  ;;  %v1053_v48 = vpop.eup %1052  ;;  %v670_v39 = vmul.f32 %v565_v50, %v459_v54  ;;  %v878_v60 = vmul.f32 %v774_v44, %v459_v54  ;;  %vm661_vm14 = vcmp.lt.s32.totalorder %v660_v52, 2 }
  0x83   :  { %1054 = vcosq.f32 %v654_v9  ;;  %vm869_vm15 = vcmp.lt.s32.totalorder %v868_v55, 2  ;;  %v1011_v62 = vadd.s32 4294967295, %v33_v0  ;;  %v461_v3 = vmul.f32 %v1053_v48, %v249_v56 }
  0x84   :  { %1056 = vsinq.f32 %v654_v9  ;;  %vm658_vm0 = vweird.f32 %v1258_v10  ;;  %v889_v23 = vsel %vm887_vm11, %v670_v39, 0.0  ;;  %v891_v8 = vsel %vm887_vm11, %v878_v60, 0.0 }
  0x85   :  { %vm888_vm1 = vcmp.lt.s32.totalorder %v1494_v58, %v1491_v53  ;;  %v906_v10 = vrot.slane %v1011_v62, %v1445_v27  ;;  %v893_v45 = vrot.slane %v889_v23, 1  ;;  %vm895_vm2 = vcmp.lt.s32.totalorder %v1430_v49, 7 }
  0x86   :  { %v898_v17 = vrot.slane %v891_v8, 1  ;;  %v912_v57 = vrot.slane %v889_v23, %v1445_v27  ;;  %v918_v21 = vrot.slane %v891_v8, %v1445_v27  ;;  %vm943_vm5 = vcmp.eq.s32.totalorder %v1430_v49, %v1491_v53 }
  0x87   :  { %vm907_vm3 = vcmp.eq.s32.totalorder %v1430_v49, %v906_v10  ;;  %vm908_vm4 = vcmp.eq.s32.totalorder %v1494_v58, %v906_v10  ;;  %vm944_vm6 = vcmp.eq.s32.totalorder %v1494_v58, %v1491_v53 }
  0x8d   :  { %v1055_v59 = vpop.eup %1054 }
  0x8e   :  { %v1057_v1 = vpop.eup %1056  ;;  %v666_v5 = vxor.u32 2147483648, %v1055_v59 }
  0x8f   :  { %v663_v46 = vxor.u32 2147483648, %v1057_v1 }
  0x90   :  { %v667_v31 = vsel %vm665_vm9, %v666_v5, %v1057_v1  ;;  %v875_v7 = vsel %vm873_vm12, %v666_v5, %v1057_v1 }
  0x91   :  { %v664_v2 = vsel %vm662_vm13, %v1055_v59, %v663_v46  ;;  %v872_v33 = vsel %vm870_vm10, %v1055_v59, %v663_v46 }
  0x92   :  { %v668_v26 = vsel %vm661_vm14, %v664_v2, %v667_v31  ;;  %v876_v35 = vsel %vm869_vm15, %v872_v33, %v875_v7 }
  0x93   :  { %v669_v11 = vsel %vm658_vm0, nan, %v668_v26  ;;  %v877_v14 = vsel %vm658_vm0, nan, %v876_v35 }
  0x94   :  { %v671_v37 = vmul.f32 %v669_v11, %v461_v3  ;;  %v879_v4 = vmul.f32 %v877_v14, %v461_v3 }
  0x96   :  { %v890_v18 = vsel %vm888_vm1, %v671_v37, 0.0  ;;  %v892_v19 = vsel %vm888_vm1, %v879_v4, 0.0 }
  0x97   :  { %v894_v28 = vrot.slane %v890_v18, 1  ;;  %v899_v30 = vrot.slane %v892_v19, 1 }
  0x99   :  { %v896_v32 = vsel %vm895_vm2, %v893_v45, %v894_v28  ;;  %v897_v22 = vsel %vm895_vm2, %v894_v28, %v893_v45  ;;  %v900_v34 = vsel %vm895_vm2, %v898_v17, %v899_v30  ;;  %v901_v25 = vsel %vm895_vm2, %v899_v30, %v898_v17 }
  0x9a   :  { %v913_v20 = vsel %vm907_vm3, %v912_v57, %v896_v32  ;;  %v914_v36 = vsel %vm908_vm4, %v912_v57, %v897_v22  ;;  %v919_v24 = vsel %vm907_vm3, %v918_v21, %v900_v34  ;;  %v920_v15 = vsel %vm908_vm4, %v918_v21, %v901_v25 }
  0x9b   :  { %v921_v9 = vsub.f32 %v913_v20, %v889_v23  ;;  %v922_v38 = vsub.f32 %v914_v36, %v890_v18  ;;  %v923_v40 = vsub.f32 %v919_v24, %v891_v8  ;;  %v924_v29 = vsub.f32 %v920_v15, %v892_v19 }
  0x9d   :  { %v925_v12 = vmul.f32 %v921_v9, %v921_v9  ;;  %v926_v13 = vmul.f32 %v922_v38, %v922_v38  ;;  %v927_v41 = vmul.f32 %v923_v40, %v923_v40  ;;  %v928_v42 = vmul.f32 %v924_v29, %v924_v29 }
  0x9e   :  { %v933_v6 = vsub.f32 0.0, %v923_v40  ;;  %v934_v43 = vsub.f32 0.0, %v924_v29 }
  0x9f   :  { %v929_v63 = vadd.f32 %v927_v41, %v925_v12  ;;  %v930_v0 = vadd.f32 %v928_v42, %v926_v13 }
  0xa1   :  { %1058 = vrsqrt.f32 %v929_v63 }
  0xa2   :  { %1060 = vrsqrt.f32 %v930_v0 }
  0xab   :  { %v1059_v16 = vpop.eup %1058 }
  0xac   :  { %v1061_v47 = vpop.eup %1060  ;;  %v935_v61 = vmul.f32 %v1059_v16, %v933_v6  ;;  %v939_v51 = vmul.f32 %v1059_v16, %v921_v9 }
  0xad   :  { %v936_v52 = vmul.f32 %v1061_v47, %v934_v43  ;;  %v940_v55 = vmul.f32 %v1061_v47, %v922_v38 }
  0xae   :  { %v937_v54 = vsel %vm887_vm11, %v935_v61, 0.0  ;;  %v941_v50 = vsel %vm887_vm11, %v939_v51, 0.0 }
  0xaf   :  { %v938_v44 = vsel %vm888_vm1, %v936_v52, 0.0  ;;  %v942_v48 = vsel %vm888_vm1, %v940_v55, 0.0  ;;  %v948_v56 = vrot.slane %v937_v54, %v1445_v27  ;;  %v956_v59 = vrot.slane %v941_v50, %v1445_v27 }
  0xb1   :  { %v949_v1 = vsel %vm943_vm5, %v948_v56, %v937_v54  ;;  %v950_v5 = vsel %vm944_vm6, %v948_v56, %v938_v44  ;;  %v957_v39 = vsel %vm943_vm5, %v956_v59, %v941_v50  ;;  %v958_v49 = vsel %vm944_vm6, %v956_v59, %v942_v48 }
  0xb2   :  { %951 = vst [vmem:[#allocation5] sm:$0xff] %v949_v1  ;;  %952 = vst [vmem:[#allocation5 + $0x8] sm:$0xff] %v950_v5 }
  0xb3   :  { %960 = vst [vmem:[#allocation5 + $0x10] sm:$0xff] %v957_v39  ;;  %961 = vst [vmem:[#allocation5 + $0x18] sm:$0xff] %v958_v49 }
  0xb4   :  { %1095 = shalt.err (!%p1092_p12)
}
  0xb5   :  { %s1096_s5 = scalar_lea.hbm %s1556_s3, 512 }
  0xb6   :  { %p1097_p13 = scmp.ne.s32.totalorder %s1556_s3, %s1096_s5  ;;  %p1100_p0 = scmp.lt.u32.totalorder %s1096_s5, %s1556_s3 }
  0xb8   :  { %p1102_p1 = pnand %p1100_p0, %p1097_p13 }
  0xba   :  { %1105 = shalt.err (!%p1102_p1)
}
  0xbb   :  { %973 = dma.vmem_to_hbm [thread:$0]  %s968_s28, 512, %s1556_s3, [#allocation4], %s1111_s22, %s1111_s22, %s1112_s23  }
  0xbc   :  { %1108 = dma.done.wait [#allocation4], 512  }
  0xbd   :  { %1109 = vsyncadd [#allocation4], 4294966784 }
  0xbe   :  { %977 = vsyncpa [#allocation3], 1 }
  0xbf   :  { %978 = vsyncpa [#allocation4], 1 }

</bundles_post_ra>
